<compile_context>
chip_gen: v5e
topology: v5e:2x2
jax: 0.10.0
libtpu: 0.0.40
codegen_flags: <defaults>
</compile_context>

<pallas_src>
import numpy as np
import jax
import jax.numpy as jnp
from jax import lax
from jax.experimental import pallas as pl
from jax.experimental.pallas import tpu as pltpu


# Fixed Diff weights, cross-correlation convention (PyTorch Conv2d).
_W00, _W01, _W10, _W11 = 3.0, -1.0, -1.0, -1.0


def _make_diff_kernel(img_w: int, hw_pad: int):
    """Kernel over a (bblk, hw_pad) slab; each sublane row is one flattened image."""
    pow2 = (img_w & (img_w - 1)) == 0

    def kernel(x_ref, o_ref):
        x = x_ref[...]                                     # (bblk, hw_pad) f32

        # Border masks at (1, hw_pad) only; the where's below sublane-broadcast
        # them, so mask generation is ~hw/128 vregs per step, not bblk*hw/1024.
        lane = lax.broadcasted_iota(jnp.int32, (1, hw_pad), 1)
        col = (lane & (img_w - 1)) if pow2 else (lane % img_w)  # tiny even if mod
        row0 = lane < img_w                                 # image row 0 -> r(-1)=1
        col0 = col == 0                                     # image col 0 -> r(-1)=1

        def rollp(a, shift):                                # lane roll (XLU)
            return pltpu.roll(a, shift % hw_pad, axis=1)

        # x[r(i-1), j]: one row up, reflected at row 0.
        xd = jnp.where(row0, rollp(x, -img_w), rollp(x, img_w))

        # shift_right(a)[i, j] = a[i, r(j-1)] (one col left, reflected at col 0).
        # shift_right is linear, so:
        #   out = shift_right(W00*xd + W10*x) + (W01*xd + W11*x)
        y = _W00 * xd + _W10 * x
        out = jnp.where(col0, rollp(y, -1), rollp(y, 1)) + (_W01 * xd + _W11 * x)
        o_ref[...] = out.astype(o_ref.dtype)

    return kernel


def _pick_batch_block(bc_pad: int, hw_pad: int, itemsize: int,
                      target_bytes: int, min_split_bytes: int) -> int:
    """Rows (images) per grid step.

    bc_pad is a multiple of 8 (wrapper pads), so a multiple-of-8 divisor always
    exists. Tiny inputs run as a single block; otherwise blocks are capped at
    ~target_bytes and we prefer >= 4 grid steps (>= 2 per v7x TC) with an even
    step count so per-TC pipelining stays active.
    """
    row_bytes = hw_pad * itemsize
    if bc_pad * row_bytes <= min_split_bytes:
        return bc_pad                                      # one small block
    cap_rows = max(8, (target_bytes // row_bytes) // 8 * 8)
    cands = [d for d in range(8, min(bc_pad, cap_rows) + 1, 8) if bc_pad % d == 0]
    if not cands:                                          # defensive: 8 | bc_pad
        return 8
    for picks in (
        [d for d in cands if bc_pad // d >= 4 and (bc_pad // d) % 2 == 0],
        [d for d in cands if bc_pad // d >= 4],
        [d for d in cands if bc_pad // d >= 2],
    ):
        if picks:
            return max(picks)
    return max(cands)


def diff_forward(x, *, target_block_bytes: int = 2 * 1024 * 1024,
                 min_split_bytes: int = 512 * 1024):
    """x: (B, C, H, W) float32 with C == 1 (matches Conv2d(1, 1, ...))."""
    B, C, H, W = x.shape
    assert C == 1, "Diff uses Conv2d(1, 1, ...): C must be 1"
    assert H >= 2 and W >= 2, "reflect padding needs spatial dims >= 2"
    bc, hw = B * C, H * W

    x2 = x.reshape(bc, hw)                                 # row-major flatten (free)

    # Pad lanes to a multiple of 128 (unmasked vst, aligned rolls) and rows to a
    # multiple of 8 (sublane tiling). Pad values never reach valid outputs.
    hw_pad = pl.cdiv(hw, 128) * 128
    bc_pad = pl.cdiv(bc, 8) * 8
    if hw_pad != hw or bc_pad != bc:
        x2 = jnp.pad(x2, ((0, bc_pad - bc), (0, hw_pad - hw)))

    itemsize = np.dtype(x.dtype).itemsize
    bblk = _pick_batch_block(bc_pad, hw_pad, itemsize,
                             target_block_bytes, min_split_bytes)
    grid = (bc_pad // bblk,)

    out = pl.pallas_call(
        _make_diff_kernel(W, hw_pad),
        grid=grid,
        in_specs=[pl.BlockSpec((bblk, hw_pad), lambda i: (i, 0))],
        out_specs=pl.BlockSpec((bblk, hw_pad), lambda i: (i, 0)),
        out_shape=jax.ShapeDtypeStruct((bc_pad, hw_pad), x.dtype),
        compiler_params=pltpu.CompilerParams(
            dimension_semantics=("parallel",),
            vmem_limit_bytes=32 * 1024 * 1024),
    )(x2)
    return out[:bc, :hw].reshape(B, C, H, W)


def diff_reference(x):
    """Independent reference: lax.conv on the reflect-padded input."""
    w = jnp.array([[_W00, _W01], [_W10, _W11]], dtype=jnp.float32)
    B, C, H, W = x.shape
    xf = x.reshape(B * C, 1, H, W)
    xp = jnp.pad(xf, ((0, 0), (0, 0), (1, 1), (1, 1)), mode="reflect")
    y = lax.conv_general_dilated(
        xp, w[None, None], window_strides=(1, 1), padding="VALID",
        dimension_numbers=("NCHW", "OIHW", "NCHW"))
    return y[:, :, :H, :W].reshape(B, C, H, W)


def _check(x, **kw):
    out = jax.block_until_ready(diff_forward(x, **kw))
    np.testing.assert_allclose(np.asarray(out), np.asarray(diff_reference(x)),
                               rtol=1e-5, atol=1e-5)


if __name__ == "__main__":
    k0, k1, k2, k3 = jax.random.split(jax.random.PRNGKey(0), 4)

    # Main case: aligned shapes, tiny input -> single block, grid=(1,).
    _check(jax.random.normal(k0, (16, 1, 16, 16), dtype=jnp.float32))

    # Small batch, padded from bc=2 to 8 sublane rows.
    _check(jax.random.normal(k1, (2, 1, 16, 16), dtype=jnp.float32))

    # Non-aligned spatial dims (H=5, W=7, non-pow2 width): exercises the lane
    # padding to 128 and the modulo column-mask path.
    _check(jax.random.normal(k2, (3, 1, 5, 7), dtype=jnp.float32))

    # Multi-block grid path (shrunk byte thresholds so a small test exercises
    # the pipelined >=4-step selection): bblk=8, grid=(8,).
    _check(jax.random.normal(k3, (64, 1, 16, 16), dtype=jnp.float32),
           target_block_bytes=8 * 1024, min_split_bytes=4 * 1024)

    print("KERNEL_OK")
</pallas_src>

<mosaic_0001>
module attributes {stable_mosaic.version = 11 : i64} {
  func.func @kernel(%arg0: i32, %arg1: memref<16x256xf32, #tpu.memory_space<vmem>>, %arg2: memref<16x256xf32, #tpu.memory_space<vmem>>) attributes {dimension_semantics = [#tpu.dimension_semantics<parallel>], iteration_bounds = array<i64: 1>, scalar_prefetch = 0 : i64, scratch_operands = 0 : i64, tpu.core_type = #tpu.core_type<tc>, window_params = [{transform_indices = @transform_0, window_bounds = array<i64: 16, 256>}, {transform_indices = @transform_1, window_bounds = array<i64: 16, 256>}]} {
    %c0 = arith.constant 0 : index
    %c0_0 = arith.constant 0 : index
    %0 = vector.load %arg1[%c0, %c0_0] : memref<16x256xf32, #tpu.memory_space<vmem>>, vector<16x256xf32>
    %1 = tpu.iota {dimensions = array<i32: 1>} : vector<1x256xi32>
    %c15_i32 = arith.constant 15 : i32
    %2 = vector.broadcast %c15_i32 : i32 to vector<1x256xi32>
    %3 = arith.andi %1, %2 : vector<1x256xi32>
    %c16_i32 = arith.constant 16 : i32
    %4 = vector.broadcast %c16_i32 : i32 to vector<1x256xi32>
    %5 = arith.cmpi slt, %1, %4 : vector<1x256xi32>
    %c0_i32 = arith.constant 0 : i32
    %6 = vector.broadcast %c0_i32 : i32 to vector<1x256xi32>
    %7 = arith.cmpi eq, %3, %6 : vector<1x256xi32>
    %c240_i32 = arith.constant 240 : i32
    %8 = tpu.dynamic_rotate %0 by %c240_i32 dim 1 : vector<16x256xf32>, i32 -> vector<16x256xf32>
    %c16_i32_1 = arith.constant 16 : i32
    %9 = tpu.dynamic_rotate %0 by %c16_i32_1 dim 1 : vector<16x256xf32>, i32 -> vector<16x256xf32>
    %10 = vector.shape_cast %5 : vector<1x256xi1> to vector<1x256xi1>
    %11 = vector.broadcast %10 : vector<1x256xi1> to vector<16x256xi1>
    %12 = arith.select %11, %8, %9 : vector<16x256xi1>, vector<16x256xf32>
    %cst = arith.constant 3.000000e+00 : f32
    %13 = vector.broadcast %cst : f32 to vector<16x256xf32>
    %14 = arith.mulf %13, %12 : vector<16x256xf32>
    %cst_2 = arith.constant -1.000000e+00 : f32
    %15 = vector.broadcast %cst_2 : f32 to vector<16x256xf32>
    %16 = arith.mulf %15, %0 : vector<16x256xf32>
    %17 = arith.addf %14, %16 : vector<16x256xf32>
    %c255_i32 = arith.constant 255 : i32
    %18 = tpu.dynamic_rotate %17 by %c255_i32 dim 1 : vector<16x256xf32>, i32 -> vector<16x256xf32>
    %c1_i32 = arith.constant 1 : i32
    %19 = tpu.dynamic_rotate %17 by %c1_i32 dim 1 : vector<16x256xf32>, i32 -> vector<16x256xf32>
    %20 = vector.shape_cast %7 : vector<1x256xi1> to vector<1x256xi1>
    %21 = vector.broadcast %20 : vector<1x256xi1> to vector<16x256xi1>
    %22 = arith.select %21, %18, %19 : vector<16x256xi1>, vector<16x256xf32>
    %cst_3 = arith.constant -1.000000e+00 : f32
    %23 = vector.broadcast %cst_3 : f32 to vector<16x256xf32>
    %24 = arith.mulf %23, %12 : vector<16x256xf32>
    %cst_4 = arith.constant -1.000000e+00 : f32
    %25 = vector.broadcast %cst_4 : f32 to vector<16x256xf32>
    %26 = arith.mulf %25, %0 : vector<16x256xf32>
    %27 = arith.addf %24, %26 : vector<16x256xf32>
    %28 = arith.addf %22, %27 : vector<16x256xf32>
    %c0_5 = arith.constant 0 : index
    %c0_6 = arith.constant 0 : index
    %29 = vector.load %arg2[%c0_5, %c0_6] : memref<16x256xf32, #tpu.memory_space<vmem>>, vector<16x256xf32>
    tpu.vector_store %arg2[%c0_5, %c0_6], %28 {strides = array<i32>} : memref<16x256xf32, #tpu.memory_space<vmem>>, vector<16x256xf32>,
    return
  }
  func.func @transform_0(%arg0: i32) -> (i32, i32) {
    %c0_i32 = arith.constant 0 : i32
    %c0_i32_0 = arith.constant 0 : i32
    return %arg0, %c0_i32 : i32, i32
  }
  func.func @transform_1(%arg0: i32) -> (i32, i32) {
    %c0_i32 = arith.constant 0 : i32
    %c0_i32_0 = arith.constant 0 : i32
    return %arg0, %c0_i32 : i32, i32
  }
}

</mosaic_0001>

<bundles_post_ra>
// kernel: tpu_custom_call.1
= control target key start
LH: loop header
LB: loop body
LE: loop exit
PB: predicated region body
PF: predicated region fallthrough
CT: control target
= control target key end

     0   :  { %6 = vsyncpa [#allocation3], 0  ;;  %s296_s0 = inlined_call_operand.hbm [shape: f32[16,256], index: 0, kind: input, shape index: {}]   ;;  %s297_s1 = inlined_call_operand.hbm [shape: f32[16,256], index: 1, kind: output, shape index: {}]  }
   0x1   :  { %7 = vsyncpa [#allocation4], 0  ;;  %s12_s8 = sshll.u32 %s296_s0, 4  ;;  %s211_s9 = smov [#allocation2]   ;;  %s13_s8 = int_to_ptr.hbm [resolvable:$true] %s12_s8 }
   0x2   :  { %s14_s10 = sshll.u32 %s211_s9, 4  ;;  %s212_s11 = smov 256   ;;  %s15_s10 = int_to_ptr.vmem [resolvable:$true] %s14_s10 }
   0x3   :  { %s213_s12 = smov 16  }
   0x4   :  { %20 = dma.hbm_to_vmem [thread:$0]  %s13_s8, 512, %s15_s10, [#allocation3], %s212_s11, %s212_s11, %s213_s12  }
   0x5   :  { %207 = dma.done.wait [#allocation3], 512  }
   0x6   :  { %208 = vsyncadd [#allocation3], 4294966784  ;;  %v26_v0 = vld [vmem:[#allocation2 + $0x8] sm:$0xff]  ;;  %v25_v1 = vld [vmem:[#allocation2] sm:$0xff]  ;;  %s214_s13 = smov 112   ;;  %v29_v7 = vlaneseq  ;;  %s215_s0 = smov 127  }
   0x7   :  { %42 = vrot.lane.b32.xlu1 %v26_v0, %s214_s13  ;;  %38 = vrot.lane.b32.xlu0 %v25_v1, %s214_s13  ;;  %v28_v2 = vld [vmem:[#allocation2 + $0x18] sm:$0xff]  ;;  %v27_v3 = vld [vmem:[#allocation2 + $0x10] sm:$0xff]  ;;  %v76_v12 = vmul.f32 -1.0, %v26_v0  ;;  %v75_v13 = vmul.f32 -1.0, %v25_v1  ;;  %s216_s14 = smov 1   ;;  %s217_s15 = smov [#allocation5]  }
   0x8   :  { %51 = vrot.lane.b32.xlu2 %v25_v1, %s213_s12  ;;  %v238_v10 = vand.u32 127, %v29_v7  ;;  %v78_v14 = vmul.f32 -1.0, %v28_v2  ;;  %v77_v15 = vmul.f32 -1.0, %v27_v3  ;;  %s137_s16 = sshll.u32 %s217_s15, 4  ;;  %s139_s19 = sshll.u32 %s297_s1, 4  ;;  %s138_s16 = int_to_ptr.vmem [resolvable:$true] %s137_s16  ;;  %s140_s19 = int_to_ptr.hbm [resolvable:$true] %s139_s19 }
   0xa   :  { %vm46_vm0 = vcmp.lt.s32.totalorder %v238_v10, 112  ;;  %vm34_vm1 = vcmp.lt.s32.totalorder %v238_v10, 16  ;;  %v31_v44 = vadd.s32 128, %v238_v10  ;;  %v32_v46 = vand.u32 15, %v238_v10 }
   0xb   :  { %vm91_vm2 = vcmp.lt.s32.totalorder %v238_v10, 127  ;;  %vm104_vm3 = vcmp.lt.s32.totalorder %v238_v10, 1 }
   0xc   :  { %v33_v47 = vand.u32 15, %v31_v44  ;;  %vm258_vm4 = vcmp.eq.s32.totalorder %v32_v46, 0 }
   0xe   :  { %vm262_vm5 = vcmp.eq.s32.totalorder %v33_v47, 0 }
   0xf   :  { %44 = vrot.lane.b32.xlu1 %v28_v2, %s214_s13  ;;  %40 = vrot.lane.b32.xlu0 %v27_v3, %s214_s13 }
  0x10   :  { %53 = vrot.lane.b32.xlu2 %v27_v3, %s213_s12 }
  0x17   :  { %57 = vrot.lane.b32.xlu1 %v28_v2, %s213_s12  ;;  %55 = vrot.lane.b32.xlu0 %v26_v0, %s213_s12 }
  0x62   :  { %v52_v6 = vpop.permute.xlu2 %51 }
  0x6a   :  { %v54_v11 = vpop.permute.xlu2 %53 }
  0x79   :  { %v43_v4 = vpop.permute.xlu1 %42  ;;  %v39_v5 = vpop.permute.xlu0 %38 }
  0x7a   :  { %v47_v16 = vsel %vm46_vm0, %v39_v5, %v43_v4 }
  0x81   :  { %v45_v8 = vpop.permute.xlu1 %44  ;;  %v41_v9 = vpop.permute.xlu0 %40 }
  0x82   :  { %v48_v17 = vsel %vm46_vm0, %v41_v9, %v45_v8 }
  0x89   :  { %v58_v18 = vpop.permute.xlu1 %57  ;;  %v56_v19 = vpop.permute.xlu0 %55 }
  0x8a   :  { %v60_v20 = vsel %vm34_vm1, %v54_v11, %v58_v18  ;;  %v62_v21 = vsel %vm34_vm1, %v58_v18, %v54_v11  ;;  %v59_v22 = vsel %vm34_vm1, %v52_v6, %v56_v19  ;;  %v61_v23 = vsel %vm34_vm1, %v56_v19, %v52_v6 }
  0x8b   :  { %v69_v24 = vsel %vm34_vm1, %v48_v17, %v62_v21  ;;  %v74_v25 = vmul.f32 3.0, %v60_v20  ;;  %v120_v26 = vmul.f32 -1.0, %v60_v20  ;;  %v67_v27 = vsel %vm34_vm1, %v47_v16, %v61_v23 }
  0x8c   :  { %v73_v28 = vmul.f32 3.0, %v69_v24  ;;  %v119_v29 = vmul.f32 -1.0, %v69_v24  ;;  %v72_v30 = vmul.f32 3.0, %v59_v22  ;;  %v117_v32 = vmul.f32 -1.0, %v67_v27 }
  0x8d   :  { %v124_v31 = vadd.f32 %v120_v26, %v78_v14  ;;  %v118_v33 = vmul.f32 -1.0, %v59_v22  ;;  %v82_v34 = vadd.f32 %v78_v14, %v74_v25  ;;  %v71_v40 = vmul.f32 3.0, %v67_v27 }
  0x8e   :  { %v80_v35 = vadd.f32 %v76_v12, %v72_v30  ;;  %v81_v36 = vadd.f32 %v77_v15, %v73_v28  ;;  %v123_v37 = vadd.f32 %v119_v29, %v77_v15  ;;  %v121_v39 = vadd.f32 %v117_v32, %v75_v13 }
  0x8f   :  { %v122_v38 = vadd.f32 %v118_v33, %v76_v12  ;;  %89 = vrot.lane.b32.xlu2 %v82_v34, %s215_s0  ;;  %v79_v41 = vadd.f32 %v75_v13, %v71_v40 }
  0x90   :  { %87 = vrot.lane.b32.xlu1 %v80_v35, %s215_s0  ;;  %85 = vrot.lane.b32.xlu0 %v81_v36, %s215_s0 }
  0x97   :  { %83 = vrot.lane.b32.xlu2 %v79_v41, %s215_s0 }
  0x98   :  { %98 = vrot.lane.b32.xlu1 %v81_v36, %s216_s14  ;;  %96 = vrot.lane.b32.xlu0 %v79_v41, %s216_s14 }
  0x9f   :  { %100 = vrot.lane.b32.xlu2 %v80_v35, %s216_s14 }
  0xa0   :  { %102 = vrot.lane.b32.xlu0 %v82_v34, %s216_s14 }
  0xe9   :  { %v90_v42 = vpop.permute.xlu2 %89 }
  0xf1   :  { %v84_v43 = vpop.permute.xlu2 %83 }
  0xf9   :  { %v101_v51 = vpop.permute.xlu2 %100 }
 0x102   :  { %v86_v45 = vpop.permute.xlu0 %85  ;;  %v88_v48 = vpop.permute.xlu1 %87 }
 0x103   :  { %v92_v53 = vsel %vm91_vm2, %v84_v43, %v88_v48  ;;  %v94_v54 = vsel %vm91_vm2, %v88_v48, %v84_v43  ;;  %v93_v63 = vsel %vm91_vm2, %v86_v45, %v90_v42  ;;  %v95_v0 = vsel %vm91_vm2, %v90_v42, %v86_v45 }
 0x10a   :  { %v97_v52 = vpop.permute.xlu0 %96  ;;  %v99_v61 = vpop.permute.xlu1 %98 }
 0x10b   :  { %v105_v55 = vsel %vm104_vm3, %v97_v52, %v101_v51  ;;  %v107_v56 = vsel %vm104_vm3, %v101_v51, %v97_v52 }
 0x10c   :  { %v113_v57 = vsel %vm258_vm4, %v92_v53, %v107_v56  ;;  %v114_v58 = vsel %vm262_vm5, %v94_v54, %v105_v55 }
 0x10d   :  { %v125_v59 = vadd.f32 %v121_v39, %v113_v57  ;;  %v126_v60 = vadd.f32 %v122_v38, %v114_v58 }
 0x10f   :  { %129 = vst [vmem:[#allocation5] sm:$0xff] %v125_v59 }
 0x110   :  { %130 = vst [vmem:[#allocation5 + $0x8] sm:$0xff] %v126_v60 }
 0x112   :  { %v103_v62 = vpop.permute.xlu0 %102 }
 0x113   :  { %v106_v1 = vsel %vm104_vm3, %v99_v61, %v103_v62  ;;  %v108_v2 = vsel %vm104_vm3, %v103_v62, %v99_v61 }
 0x114   :  { %v115_v3 = vsel %vm258_vm4, %v93_v63, %v108_v2  ;;  %v116_v4 = vsel %vm262_vm5, %v95_v0, %v106_v1 }
 0x115   :  { %v127_v5 = vadd.f32 %v123_v37, %v115_v3  ;;  %v128_v6 = vadd.f32 %v124_v31, %v116_v4 }
 0x117   :  { %131 = vst [vmem:[#allocation5 + $0x10] sm:$0xff] %v127_v5 }
 0x118   :  { %132 = vst [vmem:[#allocation5 + $0x18] sm:$0xff] %v128_v6 }
 0x119   :  { %145 = dma.vmem_to_hbm [thread:$0]  %s138_s16, 512, %s140_s19, [#allocation4], %s212_s11, %s212_s11, %s213_s12  }
 0x11a   :  { %209 = dma.done.wait [#allocation4], 512  }
 0x11b   :  { %210 = vsyncadd [#allocation4], 4294966784 }
 0x11c   :  { %150 = vsyncpa [#allocation3], 1 }
 0x11d   :  { %151 = vsyncpa [#allocation4], 1 }

</bundles_post_ra>
